<compile_context>
chip_gen: v7x
topology: tpu7x:2x2x1
jax: 0.10.0
libtpu: 0.0.40
codegen_flags: <defaults>
</compile_context>

<pallas_src>
import math

import jax
import jax.numpy as jnp
from jax import lax
from jax.experimental import pallas as pl
from jax.experimental.pallas import tpu as pltpu


def _round_up(x, m):
    return ((x + m - 1) // m) * m


def _lora_linear_kernel(x_ref, w_ref, b_ref, xa_ref, bts_ref, o_ref, acc_ref):
    """Grid = (i: row tiles, j: out-feature tiles, k: in-feature reduction).

    x_ref   (tm, tk)  activation panel                (compute dtype)
    w_ref   (tn, tk)  pretrained weight panel W[N,K]  (compute dtype)
    b_ref   (1,  tn)  bias slice                      (f32)
    xa_ref  (tm, R)   precomputed x @ A^T rows        (compute dtype)
    bts_ref (R,  tn)  (lora_B * alpha/r)^T slice      (compute dtype)
    o_ref   (tm, tn)  output tile
    acc_ref (tm, tn)  f32 accumulator scratch
    """
    k = pl.program_id(2)

    # Pretrained partial: x @ W^T (W stored (N, K); contract K with K).
    part = lax.dot_general(
        x_ref[...], w_ref[...], (((1,), (1,)), ((), ())),
        preferred_element_type=jnp.float32)                       # (tm, tn)

    # First k step writes directly with the bias folded in: no zero-fill store
    # and no first read-modify-write of the accumulator.
    @pl.when(k == 0)
    def _():
        acc_ref[...] = part + b_ref[...]

    @pl.when(k > 0)
    def _():
        acc_ref[...] += part

    @pl.when(k == pl.num_programs(2) - 1)
    def _():
        # Rank-r second LoRA matmul once per (i, j); alpha/r pre-folded into B^T.
        lora = jnp.dot(xa_ref[...], bts_ref[...],
                       preferred_element_type=jnp.float32)        # (tm, tn)
        o_ref[...] = (acc_ref[...] + lora).astype(o_ref.dtype)


def make_lora_linear(W, b, lora_A, lora_B, *, lora_alpha, r,
                     tm=512, tn=512, tk=1024,
                     compute_dtype=jnp.bfloat16, out_dtype=None):
    """One-time weight preparation; returns apply(x).

    W: (N, K) pretrained weight, b: (N,) bias or None,
    lora_A: (r, K), lora_B: (N, r).
    forward: x @ W^T + b + (x @ A^T @ B^T) * (alpha / r)
    """
    # TODO(synk): lora_dropout > 0 (training-time stochastic dropout on the LoRA
    # branch input) is not implemented; this is the default p=0.0 identity path.
    N, K = W.shape
    if r > 0:
        assert lora_A.shape == (r, K) and lora_B.shape == (N, r)
        scaling = lora_alpha / r
        R = r
        A_cd = lora_A.astype(compute_dtype)                       # (r, K)
        BtS = (lora_B.astype(jnp.float32) * scaling).T.astype(compute_dtype)  # (r, N)
    else:
        # r == 0 (or merged): LoRA branch is a no-op; rank-1 zero dummy.
        R = 1
        A_cd = jnp.zeros((1, K), compute_dtype)
        BtS = jnp.zeros((1, N), compute_dtype)

    if b is None:
        b = jnp.zeros((N,), jnp.float32)

    cd_size = jnp.dtype(compute_dtype).itemsize
    # Sublane granularity for the row dim of x blocks: 8 (f32) / 16 (bf16) / 32 (int8).
    sublane = max(8, 32 // cd_size)

    # Weight-side tile clamp (known at prepare time).
    tn = min(tn, _round_up(N, 128))
    tk = min(tk, _round_up(K, 128))
    Np, Kp = _round_up(N, tn), _round_up(K, tk)

    # One-time weight-side cast / pad (hoisted out of the per-call hot path).
    W_p = W.astype(compute_dtype)
    if (Np, Kp) != (N, K):
        W_p = jnp.pad(W_p, ((0, Np - N), (0, Kp - K)))
    b_p = b.reshape(1, N).astype(jnp.float32)                     # bias stays f32
    if Np != N:
        b_p = jnp.pad(b_p, ((0, 0), (0, Np - N)))
    BtS_p = BtS if Np == N else jnp.pad(BtS, ((0, 0), (0, Np - N)))

    def apply(x):
        orig_shape = x.shape
        assert orig_shape[-1] == K
        odtype = out_dtype if out_dtype is not None else x.dtype
        out_size = jnp.dtype(odtype).itemsize

        x2d = x.reshape(-1, K).astype(compute_dtype)
        M = x2d.shape[0]

        # Rank-r first LoRA matmul done once here (tiny M x K x r) instead of
        # being re-issued on the MXU for every (j, k) tile inside the kernel.
        xa = jnp.dot(x2d, A_cd.T,
                     preferred_element_type=jnp.float32).astype(compute_dtype)  # (M, R)

        tm_c = min(tm, _round_up(M, sublane))
        Mp = _round_up(M, tm_c)

        # Per-call padding of activations only (zero rows/cols are inert).
        x_p = x2d if (Mp, Kp) == (M, K) else jnp.pad(x2d, ((0, Mp - M), (0, Kp - K)))
        xa_p = xa if Mp == M else jnp.pad(xa, ((0, Mp - M), (0, 0)))

        grid = (Mp // tm_c, Np // tn, Kp // tk)

        # Deeper W-panel pipelining in the weight-stream-bound (small-M / decode)
        # regime: one extra buffer keeps HBM busy across k steps (v7x esp.).
        w_buffers = 3 if (grid[0] == 1 and grid[2] >= 3) else 2
        if w_buffers == 2:
            w_spec = pl.BlockSpec((tn, tk), lambda i, j, k: (j, k))
        else:
            w_spec = pl.BlockSpec((tn, tk), lambda i, j, k: (j, k),
                                  pipeline_mode=pl.Buffered(w_buffers))

        # Explicit VMEM budget: actual double-buffered footprint (x2 margin),
        # capped at 48 MiB so it stays safe on v7x's 64 MiB per-TC VMEM and is
        # always above v5e's 16 MiB scoped default.
        vmem_bytes = (2 * tm_c * tk * cd_size           # x (double buffered)
                      + w_buffers * tn * tk * cd_size   # W panel
                      + 2 * tn * 4                      # bias (f32)
                      + 2 * tm_c * R * cd_size          # x @ A^T
                      + 2 * R * tn * cd_size            # scaled B^T
                      + 2 * tm_c * tn * out_size        # output
                      + tm_c * tn * 4)                  # f32 accumulator scratch
        vmem_limit = min(48 * 1024 * 1024, max(2 * vmem_bytes, 16 * 1024 * 1024))

        cost = pl.CostEstimate(
            flops=2 * M * N * K + 2 * M * R * N,
            transcendentals=0,
            bytes_accessed=(x_p.size * cd_size + W_p.size * cd_size
                            + b_p.size * 4 + xa_p.size * cd_size
                            + BtS_p.size * cd_size + Mp * Np * out_size),
        )

        out2d = pl.pallas_call(
            _lora_linear_kernel,
            out_shape=jax.ShapeDtypeStruct((Mp, Np), odtype),
            grid_spec=pltpu.PrefetchScalarGridSpec(
                num_scalar_prefetch=0,
                grid=grid,
                in_specs=[
                    pl.BlockSpec((tm_c, tk), lambda i, j, k: (i, k)),   # x panel
                    w_spec,                                             # W (N, K) panel
                    pl.BlockSpec((1, tn), lambda i, j, k: (0, j)),      # bias slice
                    pl.BlockSpec((tm_c, R), lambda i, j, k: (i, 0)),    # x @ A^T rows
                    pl.BlockSpec((R, tn), lambda i, j, k: (0, j)),      # scaled B^T
                ],
                out_specs=pl.BlockSpec((tm_c, tn), lambda i, j, k: (i, j)),
                scratch_shapes=[pltpu.VMEM((tm_c, tn), jnp.float32)],
            ),
            compiler_params=pltpu.CompilerParams(
                dimension_semantics=("parallel", "parallel", "arbitrary"),
                vmem_limit_bytes=vmem_limit),
            cost_estimate=cost,
        )(x_p, W_p, b_p, xa_p, BtS_p)

        out = out2d[:M, :N]
        return out.reshape(*orig_shape[:-1], N)

    return apply


def lora_linear(x, W, b, lora_A, lora_B, *, lora_alpha, r, **kwargs):
    """Convenience one-shot wrapper (prefer make_lora_linear for repeated use)."""
    return make_lora_linear(W, b, lora_A, lora_B,
                            lora_alpha=lora_alpha, r=r, **kwargs)(x)


if __name__ == "__main__":
    # Small, module-consistent shapes.
    batch, seq = 2, 8
    in_features, out_features = 32, 64
    r, lora_alpha = 4, 8

    key = jax.random.PRNGKey(0)
    kx, kw, kb, ka, kbm = jax.random.split(key, 5)

    x = jax.random.normal(kx, (batch, seq, in_features), dtype=jnp.float32)

    # Deterministic parameter init (mirrors kaiming_uniform_(a=sqrt(5)) bounds).
    bound_w = 1.0 / math.sqrt(in_features)
    W = jax.random.uniform(kw, (out_features, in_features), jnp.float32,
                           minval=-bound_w, maxval=bound_w)
    bias = jax.random.uniform(kb, (out_features,), jnp.float32,
                              minval=-bound_w, maxval=bound_w)
    lora_A = jax.random.uniform(ka, (r, in_features), jnp.float32,
                                minval=-bound_w, maxval=bound_w)
    # NOTE: reset_parameters() zeroes lora_B; nonzero values here so the LoRA
    # branch is actually exercised numerically.
    lora_B = 0.1 * jax.random.normal(kbm, (out_features, r), dtype=jnp.float32)

    # Pure-JAX reference.
    scaling = lora_alpha / r
    ref = x @ W.T + bias + (x @ lora_A.T @ lora_B.T) * scaling

    # Exact-dtype path: f32 operands, tight tolerance.
    apply_f32 = make_lora_linear(W, bias, lora_A, lora_B,
                                 lora_alpha=lora_alpha, r=r,
                                 compute_dtype=jnp.float32)
    out_f32 = jax.block_until_ready(apply_f32(x))
    assert out_f32.shape == (batch, seq, out_features)
    assert jnp.allclose(out_f32, ref, atol=1e-4, rtol=1e-4), "f32 mismatch vs reference"

    # Default high-throughput path: bf16 MXU operands, f32 accumulation.
    apply_bf16 = make_lora_linear(W, bias, lora_A, lora_B,
                                  lora_alpha=lora_alpha, r=r)   # compute_dtype=bf16
    out_bf16 = jax.block_until_ready(apply_bf16(x))
    assert out_bf16.shape == (batch, seq, out_features)
    assert jnp.allclose(out_bf16, ref, atol=3e-2, rtol=3e-2), "bf16 mismatch vs reference"

    print("KERNEL_OK")
</pallas_src>

<mosaic_0001>
module attributes {stable_mosaic.version = 11 : i64} {
  func.func @_lora_linear_kernel(%arg0: i32, %arg1: i32, %arg2: i32, %arg3: memref<16x128xf32, #tpu.memory_space<vmem>>, %arg4: memref<128x128xf32, #tpu.memory_space<vmem>>, %arg5: memref<1x128xf32, #tpu.memory_space<vmem>>, %arg6: memref<16x4xf32, #tpu.memory_space<vmem>>, %arg7: memref<4x128xf32, #tpu.memory_space<vmem>>, %arg8: memref<16x128xf32, #tpu.memory_space<vmem>>, %arg9: memref<16x128xf32, #tpu.memory_space<vmem>>) attributes {dimension_semantics = [#tpu.dimension_semantics<parallel>, #tpu.dimension_semantics<parallel>, #tpu.dimension_semantics<arbitrary>], iteration_bounds = array<i64: 1, 1, 1>, scalar_prefetch = 0 : i64, scratch_operands = 1 : i64, tpu.core_type = #tpu.core_type<tc>, window_params = [{transform_indices = @transform_0, window_bounds = array<i64: 16, 128>}, {transform_indices = @transform_1, window_bounds = array<i64: 128, 128>}, {transform_indices = @transform_2, window_bounds = array<i64: 1, 128>}, {transform_indices = @transform_3, window_bounds = array<i64: 16, 4>}, {transform_indices = @transform_4, window_bounds = array<i64: 4, 128>}, {transform_indices = @transform_5, window_bounds = array<i64: 16, 128>}]} {
    %c0 = arith.constant 0 : index
    %c0_0 = arith.constant 0 : index
    %0 = vector.load %arg3[%c0, %c0_0] : memref<16x128xf32, #tpu.memory_space<vmem>>, vector<16x128xf32>
    %c0_1 = arith.constant 0 : index
    %c0_2 = arith.constant 0 : index
    %1 = vector.load %arg4[%c0_1, %c0_2] : memref<128x128xf32, #tpu.memory_space<vmem>>, vector<128x128xf32>
    %cst = arith.constant dense<0.000000e+00> : vector<16x128xf32>
    %2 = tpu.matmul %0, %1, %cst {dimension_numbers = #tpu.dot_dimension_numbers<[1], [1], [0], [0], [0, 0, 1, 0], [], []>} : vector<16x128xf32>, vector<128x128xf32>, vector<16x128xf32> -> vector<16x128xf32>
    %c0_i32 = arith.constant 0 : i32
    %3 = arith.cmpi eq, %arg2, %c0_i32 : i32
    %4 = arith.extui %3 : i1 to i32
    %c0_i32_3 = arith.constant 0 : i32
    %5 = arith.cmpi ne, %4, %c0_i32_3 : i32
    scf.if %5 {
      %c0_8 = arith.constant 0 : index
      %c0_9 = arith.constant 0 : index
      %12 = vector.load %arg5[%c0_8, %c0_9] : memref<1x128xf32, #tpu.memory_space<vmem>>, vector<1x128xf32>
      %13 = vector.broadcast %12 : vector<1x128xf32> to vector<16x128xf32>
      %14 = arith.addf %2, %13 : vector<16x128xf32>
      %c0_10 = arith.constant 0 : index
      %c0_11 = arith.constant 0 : index
      %15 = vector.load %arg9[%c0_10, %c0_11] : memref<16x128xf32, #tpu.memory_space<vmem>>, vector<16x128xf32>
      tpu.vector_store %arg9[%c0_10, %c0_11], %14 {strides = array<i32>} : memref<16x128xf32, #tpu.memory_space<vmem>>, vector<16x128xf32>,
    } else {
    }
    %c0_i32_4 = arith.constant 0 : i32
    %6 = arith.cmpi sgt, %arg2, %c0_i32_4 : i32
    %7 = arith.extui %6 : i1 to i32
    %c0_i32_5 = arith.constant 0 : i32
    %8 = arith.cmpi ne, %7, %c0_i32_5 : i32
    scf.if %8 {
      %c0_8 = arith.constant 0 : index
      %c0_9 = arith.constant 0 : index
      %12 = vector.load %arg9[%c0_8, %c0_9] : memref<16x128xf32, #tpu.memory_space<vmem>>, vector<16x128xf32>
      %13 = arith.addf %12, %2 : vector<16x128xf32>
      %c0_10 = arith.constant 0 : index
      %c0_11 = arith.constant 0 : index
      %14 = vector.load %arg9[%c0_10, %c0_11] : memref<16x128xf32, #tpu.memory_space<vmem>>, vector<16x128xf32>
      tpu.vector_store %arg9[%c0_10, %c0_11], %13 {strides = array<i32>} : memref<16x128xf32, #tpu.memory_space<vmem>>, vector<16x128xf32>,
    } else {
    }
    %c0_i32_6 = arith.constant 0 : i32
    %9 = arith.cmpi eq, %arg2, %c0_i32_6 : i32
    %10 = arith.extui %9 : i1 to i32
    %c0_i32_7 = arith.constant 0 : i32
    %11 = arith.cmpi ne, %10, %c0_i32_7 : i32
    scf.if %11 {
      %c0_8 = arith.constant 0 : index
      %c0_9 = arith.constant 0 : index
      %12 = vector.load %arg6[%c0_8, %c0_9] : memref<16x4xf32, #tpu.memory_space<vmem>>, vector<16x4xf32>
      %c0_10 = arith.constant 0 : index
      %c0_11 = arith.constant 0 : index
      %13 = vector.load %arg7[%c0_10, %c0_11] : memref<4x128xf32, #tpu.memory_space<vmem>>, vector<4x128xf32>
      %cst_12 = arith.constant dense<0.000000e+00> : vector<16x128xf32>
      %14 = tpu.matmul %12, %13, %cst_12 {dimension_numbers = #tpu.dot_dimension_numbers<[1], [0], [0], [1], [0, 0, 1, 1], [], []>} : vector<16x4xf32>, vector<4x128xf32>, vector<16x128xf32> -> vector<16x128xf32>
      %c0_13 = arith.constant 0 : index
      %c0_14 = arith.constant 0 : index
      %15 = vector.load %arg9[%c0_13, %c0_14] : memref<16x128xf32, #tpu.memory_space<vmem>>, vector<16x128xf32>
      %16 = arith.addf %15, %14 : vector<16x128xf32>
      %c0_15 = arith.constant 0 : index
      %c0_16 = arith.constant 0 : index
      %17 = vector.load %arg8[%c0_15, %c0_16] : memref<16x128xf32, #tpu.memory_space<vmem>>, vector<16x128xf32>
      tpu.vector_store %arg8[%c0_15, %c0_16], %16 {strides = array<i32>} : memref<16x128xf32, #tpu.memory_space<vmem>>, vector<16x128xf32>,
    } else {
    }
    return
  }
  func.func @transform_0(%arg0: i32, %arg1: i32, %arg2: i32) -> (i32, i32) {
    %c0_i32 = arith.constant 0 : i32
    return %arg0, %arg2 : i32, i32
  }
  func.func @transform_1(%arg0: i32, %arg1: i32, %arg2: i32) -> (i32, i32) {
    %c0_i32 = arith.constant 0 : i32
    return %arg1, %arg2 : i32, i32
  }
  func.func @transform_2(%arg0: i32, %arg1: i32, %arg2: i32) -> (i32, i32) {
    %c0_i32 = arith.constant 0 : i32
    %c0_i32_0 = arith.constant 0 : i32
    return %c0_i32, %arg1 : i32, i32
  }
  func.func @transform_3(%arg0: i32, %arg1: i32, %arg2: i32) -> (i32, i32) {
    %c0_i32 = arith.constant 0 : i32
    %c0_i32_0 = arith.constant 0 : i32
    return %arg0, %c0_i32 : i32, i32
  }
  func.func @transform_4(%arg0: i32, %arg1: i32, %arg2: i32) -> (i32, i32) {
    %c0_i32 = arith.constant 0 : i32
    %c0_i32_0 = arith.constant 0 : i32
    return %c0_i32, %arg1 : i32, i32
  }
  func.func @transform_5(%arg0: i32, %arg1: i32, %arg2: i32) -> (i32, i32) {
    %c0_i32 = arith.constant 0 : i32
    return %arg0, %arg1 : i32, i32
  }
}

</mosaic_0001>

<bundles_post_ra>
// kernel: tpu_custom_call.1
= control target key start
LH: loop header
LB: loop body
LE: loop exit
PB: predicated region body
PF: predicated region fallthrough
CT: control target
= control target key end

     0   :  { %10 = vsyncpa [#allocation4], 0  ;;  %s503_s0 = inlined_call_operand.vmem [shape: f32[16,128], index: 0, kind: input, shape index: {}]   ;;  %s504_s1 = inlined_call_operand.hbm [shape: f32[128,128], index: 1, kind: input, shape index: {}]   ;;  %s505_s2 = inlined_call_operand.vmem [shape: f32[1,128], index: 2, kind: input, shape index: {}]   ;;  %s506_s3 = inlined_call_operand.vmem [shape: f32[16,4], index: 3, kind: input, shape index: {}]   ;;  %s507_s4 = inlined_call_operand.vmem [shape: f32[4,128], index: 4, kind: input, shape index: {}]   ;;  %s508_s5 = inlined_call_operand.hbm [shape: f32[16,128], index: 5, kind: output, shape index: {}]  }
   0x1   :  { %11 = vsyncpa [#allocation5], 0  ;;  %s421_s18 = smov [#allocation3]   ;;  %s373_s22 = scalar_lea.hbm %s504_s1, 2048 }
   0x2   :  { %s19_s19 = sshll.u32 %s421_s18, 4  ;;  %p374_p0 = scmp.ne.s32.totalorder %s504_s1, %s373_s22  ;;  %s20_s19 = int_to_ptr.vmem [resolvable:$true] %s19_s19 }
   0x3   :  { %p377_p1 = scmp.lt.u32.totalorder %s373_s22, %s504_s1 }
   0x5   :  { %p379_p2 = pnand %p377_p1, %p374_p0 }
   0x7   :  { %382 = shalt.err (!%p379_p2)
}
   0x8   :  { %s383_s27 = scalar_lea.vmem %s20_s19, 2048  ;;  %p388_p4 = scmp.lt.s32.totalorder %s20_s19, %s20_s19 }
   0x9   :  { %p384_p3 = scmp.ne.s32.totalorder %s20_s19, %s383_s27  ;;  %p389_p5 = scmp.lt.s32.totalorder %s383_s27, %s383_s27 }
   0xb   :  { %p390_p6 = por %p389_p5, %p388_p4 }
   0xd   :  { %p391_p7 = pnand %p390_p6, %p384_p3 }
   0xf   :  { %394 = shalt.err (!%p391_p7)
}
  0x10   :  { %s422_s28 = smov 128   ;;  %s423_s29 = smov 8  }
  0x11   :  { %25 = dma.hbm_to_vmem [thread:$0]  %s504_s1, 2048, %s20_s19, [#allocation4], %s422_s28, %s422_s28, %s423_s29  }
  0x12   :  { %417 = dma.done.wait [#allocation4], 2048  }
  0x13   :  { %418 = vsyncadd [#allocation4], 4294965248  ;;  %v37_v0 = vld [vmem:[#allocation3] sm:$0xff]  ;;  %v38_v1 = vld [vmem:[#allocation3 + $0x8] sm:$0xff]  ;;  %vm166_vm0 = vcmask 1043456   ;;  %vm159_vm1 = vcmask 31744  }
  0x14   :  { %v39_v2 = vld [vmem:[#allocation3 + $0x10] sm:$0xff]  ;;  %v333_v3 = vpack.c.bf16 %v38_v1, %v37_v0  ;;  %v40_v4 = vld [vmem:[#allocation3 + $0x18] sm:$0xff]  ;;  %v41_v6 = vld [vmem:[#allocation3 + $0x20] sm:$0xff]  ;;  %s424_s16 = smov [#allocation6]  }
  0x15   :  { %v337_v5 = vpack.c.bf16 %v40_v4, %v39_v2  ;;  %v35_v7 = vld [vmem:[%s503_s0] sm:$0xff]  ;;  %v42_v9 = vld [vmem:[#allocation3 + $0x28] sm:$0xff]  ;;  %v43_v13 = vld [vmem:[#allocation3 + $0x30] sm:$0xff]  ;;  %s256_s17 = sshll.u32 %s424_s16, 4  ;;  %s257_s17 = int_to_ptr.vmem [resolvable:$true] %s256_s17 }
  0x16   :  { %334 = vmatprep.subr.bf16.mxu1 %v333_v3  ;;  %v158_v8 = vld [vmem:[%s507_s4] sm:$0xf]  ;;  %325 = vmatprep.mubr.f32.mxu1 %v35_v7  ;;  %v157_v11 = vld [vmem:[%s506_s3 + $0x8] sm:$0xff]  ;;  %v341_v12 = vpack.c.bf16 %v42_v9, %v41_v6  ;;  %v44_v14 = vld [vmem:[#allocation3 + $0x38] sm:$0xff]  ;;  %s395_s18 = scalar_lea.vmem %s257_s17, 256  ;;  %p400_p9 = scmp.lt.s32.totalorder %s257_s17, %s257_s17 }
  0x17   :  { %336 = vmatpush3.bf16.xpose.msra.mxu1 %v333_v3  ;;  %328 = vmatprep.subr.msk.mxu0 %vm166_vm0, %v158_v8  ;;  %v156_v10 = vld [vmem:[%s506_s3] sm:$0xff]  ;;  %v345_v15 = vpack.c.bf16 %v44_v14, %v43_v13  ;;  %v46_v17 = vld [vmem:[#allocation3 + $0x48] sm:$0xff]  ;;  %v47_v19 = vld [vmem:[#allocation3 + $0x50] sm:$0xff]  ;;  %p396_p8 = scmp.ne.s32.totalorder %s257_s17, %s395_s18  ;;  %p401_p10 = scmp.lt.s32.totalorder %s395_s18, %s395_s18 }
  0x18   :  { %338 = vmatprep.subr.bf16.mxu1 %v337_v5  ;;  %329 = vmatpush3.msk.msra.mxu0 %vm166_vm0, %v158_v8  ;;  %v45_v16 = vld [vmem:[#allocation3 + $0x40] sm:$0xff]  ;;  %v48_v20 = vld [vmem:[#allocation3 + $0x58] sm:$0xff]  ;;  %v50_v23 = vld [vmem:[#allocation3 + $0x68] sm:$0xff] }
  0x19   :  { %330 = vmatprep.mubr.msk.f32.mxu0 %vm159_vm1, %v156_v10  ;;  %v349_v18 = vpack.c.bf16 %v46_v17, %v45_v16  ;;  %v353_v21 = vpack.c.bf16 %v48_v20, %v47_v19  ;;  %v49_v22 = vld [vmem:[#allocation3 + $0x60] sm:$0xff]  ;;  %v51_v25 = vld [vmem:[#allocation3 + $0x70] sm:$0xff]  ;;  %v52_v26 = vld [vmem:[#allocation3 + $0x78] sm:$0xff]  ;;  %p402_p11 = por %p401_p10, %p400_p9 }
  0x1a   :  { %331 = vmatmul.mubr.msk.f32.vlgmr.msra.gmra.mrb[0].mxu0 %vm159_vm1, %v157_v11  ;;  %v357_v24 = vpack.c.bf16 %v50_v23, %v49_v22  ;;  %v361_v27 = vpack.c.bf16 %v52_v26, %v51_v25  ;;  %v36_v28 = vld [vmem:[%s503_s0 + $0x8] sm:$0xff]  ;;  %v268_v31 = vld [vmem:[%s505_s2] ss:$0 sm:$0xff] }
  0x1b   :  { %p403_p12 = pnand %p402_p11, %p396_p8 }
  0x1f   :  { %340 = vmatpush3.bf16.xpose.msra.mxu1 %v337_v5 }
  0x20   :  { %342 = vmatprep.subr.bf16.mxu1 %v341_v12 }
  0x27   :  { %344 = vmatpush3.bf16.xpose.msra.mxu1 %v341_v12 }
  0x28   :  { %346 = vmatprep.subr.bf16.mxu1 %v345_v15 }
  0x2f   :  { %348 = vmatpush3.bf16.xpose.msra.mxu1 %v345_v15 }
  0x30   :  { %350 = vmatprep.subr.bf16.mxu1 %v349_v18 }
  0x37   :  { %352 = vmatpush3.bf16.xpose.msra.mxu1 %v349_v18 }
  0x38   :  { %354 = vmatprep.subr.bf16.mxu1 %v353_v21 }
  0x3f   :  { %356 = vmatpush3.bf16.xpose.msra.mxu1 %v353_v21 }
  0x40   :  { %358 = vmatprep.subr.bf16.mxu1 %v357_v24 }
  0x47   :  { %360 = vmatpush3.bf16.xpose.msra.mxu1 %v357_v24 }
  0x48   :  { %362 = vmatprep.subr.bf16.mxu1 %v361_v27 }
  0x4f   :  { %364 = vmatpush3.bf16.xpose.msra.mxu1 %v361_v27 }
  0x56   :  { %326 = vmatmul.mubr.f32.vlgmr.msra.gmra.mrb[0].mxu1 %v36_v28 }
  0xed   :  { %v332_v29 = vpop.f32.mrb[0].mxu0 }
  0xee   :  { %v236_v30 = vpop.f32.mrb[1].mxu0 }
 0x129   :  { %v327_v32 = vpop.f32.mrb[0].mxu1 }
 0x12a   :  { %v140_v33 = vadd.f32 %v327_v32, %v268_v31  ;;  %v119_v34 = vpop.f32.mrb[1].mxu1 }
 0x12b   :  { %v139_v35 = vadd.f32 %v268_v31, %v119_v34 }
 0x12c   :  { %v248_v36 = vadd.f32 %v332_v29, %v140_v33 }
 0x12d   :  { %v247_v37 = vadd.f32 %v236_v30, %v139_v35 }
 0x12e   :  { %250 = vst [vmem:[#allocation6 + $0x8] sm:$0xff] %v248_v36 }
 0x12f   :  { %249 = vst [vmem:[#allocation6] sm:$0xff] %v247_v37 }
 0x130   :  { %406 = shalt.err (!%p403_p12)
}
 0x131   :  { %s407_s19 = scalar_lea.hbm %s508_s5, 256 }
 0x132   :  { %p408_p13 = scmp.ne.s32.totalorder %s508_s5, %s407_s19  ;;  %p411_p0 = scmp.lt.u32.totalorder %s407_s19, %s508_s5 }
 0x134   :  { %p413_p1 = pnand %p411_p0, %p408_p13 }
 0x136   :  { %416 = shalt.err (!%p413_p1)
}
 0x137   :  { %262 = dma.vmem_to_hbm [thread:$0]  %s257_s17, 256, %s508_s5, [#allocation5], %s422_s28, %s422_s28, %s423_s29  }
 0x138   :  { %419 = dma.done.wait [#allocation5], 256  }
 0x139   :  { %420 = vsyncadd [#allocation5], 4294967040 }
 0x13a   :  { %266 = vsyncpa [#allocation4], 1 }
 0x13b   :  { %267 = vsyncpa [#allocation5], 1 }

</bundles_post_ra>
